<compile_context>
chip_gen: v6e
topology: v6e:2x2x1
jax: 0.10.0
libtpu: 0.0.40
codegen_flags: <defaults>
</compile_context>

<pallas_src>
import jax
import jax.numpy as jnp
from jax.experimental import pallas as pl
from jax.experimental.pallas import tpu as pltpu

IN_FEATURES = 784      # 1 * 28 * 28
HID = 100
HID_PAD = 128          # lane-dense hidden width (zero-padded)
OUT = 10
OUT_PAD = 128          # lane-dense output width (zero-padded)
TILE_B_MAX = 2048      # per-tile rows; ~15 MiB double-buffered f32 working set


def mlp_kernel(x_ref, w0_ref, b0_ref, w1_ref, b1_ref, o_ref):
    # x_ref : (TILE_B, 784)  f32  (bf16 cast done here, hidden under the DMA)
    # w0_ref: (784, 128)     bf16 (cols 100..127 are zero)
    # b0_ref: (1, 128)       f32  (cols 100..127 are zero)
    # w1_ref: (128, 128)     bf16 (rows 100.. and cols 10.. are zero)
    # b1_ref: (1, 128)       f32  (cols 10..127 are zero)
    # o_ref : (TILE_B, 128)  f32
    x = x_ref[...].astype(jnp.bfloat16)

    # fc_layer0: bf16 MXU matmul, f32 accumulate; bias add on the VPU in f32.
    h = jnp.dot(x, w0_ref[...], preferred_element_type=jnp.float32) + b0_ref[...]

    # d_l: Dropout(p=0.5) — inference-mode identity.
    # TODO(synk): training-mode dropout cannot reproduce PyTorch's RNG stream;
    # eval() semantics (identity) are implemented here.

    # af_layer1: ReLU
    h = jnp.maximum(h, 0.0)

    # fc_layer2: bf16 MXU matmul, f32 accumulate, lane-dense (128-wide) store.
    out = jnp.dot(h.astype(jnp.bfloat16), w1_ref[...],
                  preferred_element_type=jnp.float32) + b1_ref[...]
    o_ref[...] = out.astype(o_ref.dtype)


def prepare_params(w0, b0, w1, b1):
    """One-time parameter preprocessing (hoisted out of the per-call path).

    Takes nn.Linear-shaped params (W: (out, in), b: (out,)) and returns the
    transposed, zero-padded, bf16-cast tensors the kernel consumes.
    """
    w0 = jnp.asarray(w0, jnp.float32)   # (100, 784)
    b0 = jnp.asarray(b0, jnp.float32)   # (100,)
    w1 = jnp.asarray(w1, jnp.float32)   # (10, 100)
    b1 = jnp.asarray(b1, jnp.float32)   # (10,)

    # fc0: (784, 100) -> pad hidden to 128 lanes.
    w0_p = jnp.zeros((IN_FEATURES, HID_PAD), jnp.float32).at[:, :HID].set(w0.T)
    b0_p = jnp.zeros((1, HID_PAD), jnp.float32).at[0, :HID].set(b0)

    # fc2: (100, 10) -> pad K to 128 and output to 128 lanes.
    w1_p = jnp.zeros((HID_PAD, OUT_PAD), jnp.float32).at[:HID, :OUT].set(w1.T)
    b1_p = jnp.zeros((1, OUT_PAD), jnp.float32).at[0, :OUT].set(b1)

    return (w0_p.astype(jnp.bfloat16), b0_p,
            w1_p.astype(jnp.bfloat16), b1_p)


def _round_up(x, m):
    return ((x + m - 1) // m) * m


def _choose_tile_b(B):
    """Batch tile: multiple of 8 (or the full batch if B <= 8), capped so the
    grid has >= 2 steps when possible (v7x megacore), up to TILE_B_MAX."""
    if B <= 8:
        return B                       # block equals the full batch dim
    half = _round_up((B + 1) // 2, 8)  # aim for >= 2 grid steps
    return min(TILE_B_MAX, half)


@jax.jit
def mlp_forward(x_nchw, w0_p, b0_p, w1_p, b1_p):
    """x_nchw: (B, C, H, W) with C*H*W == 784. Returns (B, 10) float32."""
    B = x_nchw.shape[0]
    x_flat = x_nchw.reshape(B, -1)     # (B, 784) f32 — no wrapper cast, no pad

    tile_b = _choose_tile_b(B)
    grid = (pl.cdiv(B, tile_b),)       # partial last block handled by Pallas

    # Advisory cost hint: dominated by the f32 x read and the padded out write.
    flops = 2 * B * (IN_FEATURES * HID_PAD + HID_PAD * OUT_PAD)
    bytes_accessed = (B * IN_FEATURES * 4            # x (f32)
                      + IN_FEATURES * HID_PAD * 2    # w0 (bf16)
                      + HID_PAD * OUT_PAD * 2        # w1 (bf16)
                      + 2 * HID_PAD * 4              # biases
                      + B * OUT_PAD * 4)             # out (f32)

    out_padded = pl.pallas_call(
        mlp_kernel,
        out_shape=jax.ShapeDtypeStruct((B, OUT_PAD), jnp.float32),
        grid=grid,
        in_specs=[
            pl.BlockSpec((tile_b, IN_FEATURES), lambda i: (i, 0)),   # x tile
            pl.BlockSpec((IN_FEATURES, HID_PAD), lambda i: (0, 0)),  # w0 (resident)
            pl.BlockSpec((1, HID_PAD), lambda i: (0, 0)),            # b0
            pl.BlockSpec((HID_PAD, OUT_PAD), lambda i: (0, 0)),      # w1
            pl.BlockSpec((1, OUT_PAD), lambda i: (0, 0)),            # b1
        ],
        out_specs=pl.BlockSpec((tile_b, OUT_PAD), lambda i: (i, 0)),
        compiler_params=pltpu.CompilerParams(
            dimension_semantics=("parallel",),
            vmem_limit_bytes=32 * 1024 * 1024,
        ),
        cost_estimate=pl.CostEstimate(
            flops=flops, transcendentals=0, bytes_accessed=bytes_accessed),
    )(x_flat, w0_p, b0_p, w1_p, b1_p)

    # Only the 10 real output columns; rows are already exactly B.
    return out_padded[:, :OUT]


def init_params(key):
    """Deterministic init matching nn.Linear shapes: W (out, in), b (out,)."""
    k0, k1, k2, k3 = jax.random.split(key, 4)
    bound0 = 1.0 / jnp.sqrt(784.0)
    bound1 = 1.0 / jnp.sqrt(100.0)
    w0 = jax.random.uniform(k0, (100, 784), jnp.float32, -bound0, bound0)
    b0 = jax.random.uniform(k1, (100,), jnp.float32, -bound0, bound0)
    w1 = jax.random.uniform(k2, (10, 100), jnp.float32, -bound1, bound1)
    b1 = jax.random.uniform(k3, (10,), jnp.float32, -bound1, bound1)
    return w0, b0, w1, b1


if __name__ == "__main__":
    key = jax.random.PRNGKey(0)
    k_x, k_p = jax.random.split(key)

    # MNIST-like input: batch=2, NCHW (2, 1, 28, 28) -> flatten to 784.
    x = jax.random.normal(k_x, (2, 1, 28, 28), jnp.float32)
    w0, b0, w1, b1 = init_params(k_p)

    # One-time parameter prep (transpose + lane padding + bf16 cast).
    params = prepare_params(w0, b0, w1, b1)

    out = jax.block_until_ready(mlp_forward(x, *params))

    # Sanity check against a pure-JAX f32 reference (eval-mode dropout = identity).
    # Tolerance loosened for the bf16-input / f32-accumulate MXU path.
    x_flat = x.reshape(2, -1)
    ref = jnp.maximum(x_flat @ w0.T + b0, 0.0) @ w1.T + b1
    assert out.shape == (2, 10)
    assert jnp.allclose(out, ref, atol=5e-2, rtol=5e-2), (
        f"max abs diff {jnp.max(jnp.abs(out - ref))}")

    print("KERNEL_OK")
</pallas_src>

<mosaic_0001>
module attributes {stable_mosaic.version = 11 : i64} {
  func.func @mlp_kernel(%arg0: i32, %arg1: memref<2x784xf32, #tpu.memory_space<vmem>>, %arg2: memref<784x128xbf16, #tpu.memory_space<vmem>>, %arg3: memref<1x128xf32, #tpu.memory_space<vmem>>, %arg4: memref<128x128xbf16, #tpu.memory_space<vmem>>, %arg5: memref<1x128xf32, #tpu.memory_space<vmem>>, %arg6: memref<2x128xf32, #tpu.memory_space<vmem>>) attributes {dimension_semantics = [#tpu.dimension_semantics<parallel>], iteration_bounds = array<i64: 1>, scalar_prefetch = 0 : i64, scratch_operands = 0 : i64, tpu.core_type = #tpu.core_type<tc>, window_params = [{transform_indices = @transform_0, window_bounds = array<i64: 2, 784>}, {pipeline_mode = #tpu.pipeline_mode<synchronous>, transform_indices = @transform_1, window_bounds = array<i64: 784, 128>}, {pipeline_mode = #tpu.pipeline_mode<synchronous>, transform_indices = @transform_2, window_bounds = array<i64: 1, 128>}, {pipeline_mode = #tpu.pipeline_mode<synchronous>, transform_indices = @transform_3, window_bounds = array<i64: 128, 128>}, {pipeline_mode = #tpu.pipeline_mode<synchronous>, transform_indices = @transform_4, window_bounds = array<i64: 1, 128>}, {transform_indices = @transform_5, window_bounds = array<i64: 2, 128>}]} {
    %c0 = arith.constant 0 : index
    %c0_0 = arith.constant 0 : index
    %0 = vector.load %arg1[%c0, %c0_0] : memref<2x784xf32, #tpu.memory_space<vmem>>, vector<2x784xf32>
    %1 = arith.truncf %0 : vector<2x784xf32> to vector<2x784xbf16>
    %c0_1 = arith.constant 0 : index
    %c0_2 = arith.constant 0 : index
    %2 = vector.load %arg2[%c0_1, %c0_2] : memref<784x128xbf16, #tpu.memory_space<vmem>>, vector<784x128xbf16>
    %cst = arith.constant dense<0.000000e+00> : vector<2x128xf32>
    %3 = tpu.matmul %1, %2, %cst {dimension_numbers = #tpu.dot_dimension_numbers<[1], [0], [0], [1], [0, 0, 1, 1], [], []>} : vector<2x784xbf16>, vector<784x128xbf16>, vector<2x128xf32> -> vector<2x128xf32>
    %c0_3 = arith.constant 0 : index
    %c0_4 = arith.constant 0 : index
    %4 = vector.load %arg3[%c0_3, %c0_4] : memref<1x128xf32, #tpu.memory_space<vmem>>, vector<1x128xf32>
    %5 = vector.broadcast %4 : vector<1x128xf32> to vector<2x128xf32>
    %6 = arith.addf %3, %5 : vector<2x128xf32>
    %cst_5 = arith.constant 0.000000e+00 : f32
    %7 = vector.broadcast %cst_5 : f32 to vector<2x128xf32>
    %8 = arith.maximumf %6, %7 : vector<2x128xf32>
    %9 = arith.truncf %8 : vector<2x128xf32> to vector<2x128xbf16>
    %c0_6 = arith.constant 0 : index
    %c0_7 = arith.constant 0 : index
    %10 = vector.load %arg4[%c0_6, %c0_7] : memref<128x128xbf16, #tpu.memory_space<vmem>>, vector<128x128xbf16>
    %cst_8 = arith.constant dense<0.000000e+00> : vector<2x128xf32>
    %11 = tpu.matmul %9, %10, %cst_8 {dimension_numbers = #tpu.dot_dimension_numbers<[1], [0], [0], [1], [0, 0, 1, 1], [], []>} : vector<2x128xbf16>, vector<128x128xbf16>, vector<2x128xf32> -> vector<2x128xf32>
    %c0_9 = arith.constant 0 : index
    %c0_10 = arith.constant 0 : index
    %12 = vector.load %arg5[%c0_9, %c0_10] : memref<1x128xf32, #tpu.memory_space<vmem>>, vector<1x128xf32>
    %13 = vector.broadcast %12 : vector<1x128xf32> to vector<2x128xf32>
    %14 = arith.addf %11, %13 : vector<2x128xf32>
    %c0_11 = arith.constant 0 : index
    %c0_12 = arith.constant 0 : index
    %15 = vector.load %arg6[%c0_11, %c0_12] : memref<2x128xf32, #tpu.memory_space<vmem>>, vector<2x128xf32>
    tpu.vector_store %arg6[%c0_11, %c0_12], %14 {strides = array<i32>} : memref<2x128xf32, #tpu.memory_space<vmem>>, vector<2x128xf32>,
    return
  }
  func.func @transform_0(%arg0: i32) -> (i32, i32) {
    %c0_i32 = arith.constant 0 : i32
    %c0_i32_0 = arith.constant 0 : i32
    return %arg0, %c0_i32 : i32, i32
  }
  func.func @transform_1(%arg0: i32) -> (i32, i32) {
    %c0_i32 = arith.constant 0 : i32
    %c0_i32_0 = arith.constant 0 : i32
    %c0_i32_1 = arith.constant 0 : i32
    return %c0_i32, %c0_i32_0 : i32, i32
  }
  func.func @transform_2(%arg0: i32) -> (i32, i32) {
    %c0_i32 = arith.constant 0 : i32
    %c0_i32_0 = arith.constant 0 : i32
    %c0_i32_1 = arith.constant 0 : i32
    return %c0_i32, %c0_i32_0 : i32, i32
  }
  func.func @transform_3(%arg0: i32) -> (i32, i32) {
    %c0_i32 = arith.constant 0 : i32
    %c0_i32_0 = arith.constant 0 : i32
    %c0_i32_1 = arith.constant 0 : i32
    return %c0_i32, %c0_i32_0 : i32, i32
  }
  func.func @transform_4(%arg0: i32) -> (i32, i32) {
    %c0_i32 = arith.constant 0 : i32
    %c0_i32_0 = arith.constant 0 : i32
    %c0_i32_1 = arith.constant 0 : i32
    return %c0_i32, %c0_i32_0 : i32, i32
  }
  func.func @transform_5(%arg0: i32) -> (i32, i32) {
    %c0_i32 = arith.constant 0 : i32
    %c0_i32_0 = arith.constant 0 : i32
    return %arg0, %c0_i32 : i32, i32
  }
}

</mosaic_0001>

<bundles_post_ra>
// kernel: mlp_forward.1
= control target key start
LH: loop header
LB: loop body
LE: loop exit
PB: predicated region body
PF: predicated region fallthrough
CT: control target
= control target key end

     0   :  { %10 = vsyncpa [#allocation3], 0  ;;  %s1145_s0 = inlined_call_operand.vmem [shape: f32[2,784], index: 0, kind: input, shape index: {}]   ;;  %s1146_s1 = inlined_call_operand.hbm [shape: bf16[784,128], index: 1, kind: input, shape index: {}]   ;;  %s1147_s2 = inlined_call_operand.vmem [shape: f32[1,128], index: 2, kind: input, shape index: {}]   ;;  %s1148_s3 = inlined_call_operand.vmem [shape: bf16[128,128], index: 3, kind: input, shape index: {}]   ;;  %s1149_s4 = inlined_call_operand.vmem [shape: f32[1,128], index: 4, kind: input, shape index: {}]   ;;  %s1150_s5 = inlined_call_operand.hbm [shape: f32[2,128], index: 5, kind: output, shape index: {}]  }
   0x1   :  { %11 = vsyncpa [#allocation4], 0  ;;  %s1052_s18 = smov [#allocation2]  }
   0x2   :  { %s19_s19 = sshll.u32 %s1052_s18, 4  ;;  %s20_s19 = int_to_ptr.vmem [resolvable:$true] %s19_s19 }
   0x3   :  { %s1016_s20 = scalar_lea.vmem %s20_s19, 6272  ;;  %p1021_p1 = scmp.lt.s32.totalorder %s20_s19, %s20_s19 }
   0x4   :  { %p1017_p0 = scmp.ne.s32.totalorder %s20_s19, %s1016_s20  ;;  %p1022_p2 = scmp.lt.s32.totalorder %s1016_s20, %s1016_s20 }
   0x6   :  { %p1023_p3 = por %p1022_p2, %p1021_p1 }
   0x8   :  { %p1024_p4 = pnand %p1023_p3, %p1017_p0 }
   0xa   :  { %1027 = shalt.err (!%p1024_p4)
}
   0xb   :  { %s1053_s21 = smov 64   ;;  %s1054_s22 = smov 4  }
   0xc   :  { %25 = dma.hbm_to_vmem [thread:$0]  %s1146_s1, 6272, %s20_s19, [#allocation3], %s1053_s21, %s1053_s21, %s1054_s22  }
   0xd   :  { %1048 = dma.done.wait [#allocation3], 6272  }
   0xe   :  { %1049 = vsyncadd [#allocation3], 4294961024  ;;  %v949_v0 = vld [vmem:[#allocation2 + $0x78] sm:$0xff]   ;;  %v953_v4 = vld [vmem:[#allocation2 + $0x70] sm:$0xff]   ;;  %v1055_v21 = vmov 1983009808   ;;  %v44_v23 = vlaneseq }
   0xf   :  { %v950_v1 = vld [vmem:[#allocation2 + $0x38] sm:$0xff]   ;;  %839 = vmatprep.subr.bf16.mxu0 %v949_v0  ;;  %v954_v5 = vld [vmem:[#allocation2 + $0x30] sm:$0xff]   ;;  %v957_v8 = vld [vmem:[#allocation2 + $0x68] sm:$0xff]   ;;  %v42_v22 = vunpack.c.l.s4 %v1055_v21  ;;  %v1056_v45 = vmov 0.0   ;;  %vm1057_vm0 = vmmov 0   ;;  %vm486_vm1 = vcmask 130048  }
  0x10   :  { %v951_v2 = vld [vmem:[#allocation2 + $0xf8] sm:$0xff]   ;;  %840 = vmatpush3.bf16.msra.mxu0 %v950_v1  ;;  %v955_v6 = vld [vmem:[#allocation2 + $0xf0] sm:$0xff]   ;;  %v958_v9 = vld [vmem:[#allocation2 + $0x28] sm:$0xff]   ;;  %v45_v29 = vshrl.u32 %v44_v23, 7  ;;  %s1058_s21 = smov [#allocation5]  }
  0x11   :  { %v952_v3 = vld [vmem:[#allocation2 + $0xb8] sm:$0xff]   ;;  %861 = vmatprep.subr.bf16.mxu1 %v951_v2  ;;  %841 = vmatprep.subr.bf16.mxu0 %v953_v4  ;;  %v956_v7 = vld [vmem:[#allocation2 + $0xb0] sm:$0xff]   ;;  %v959_v10 = vld [vmem:[#allocation2 + $0xe8] sm:$0xff]   ;;  %v43_v28 = vunpack.c.0.s8 %v42_v22  ;;  %s770_s22 = sshll.u32 %s1058_s21, 4  ;;  %s771_s22 = int_to_ptr.vmem [resolvable:$true] %s770_s22 }
  0x12   :  { %862 = vmatpush3.bf16.msra.mxu1 %v952_v3  ;;  %v960_v11 = vld [vmem:[#allocation2 + $0xa8] sm:$0xff]   ;;  %v961_v12 = vld [vmem:[#allocation2 + $0x60] sm:$0xff]   ;;  %v965_v16 = vld [vmem:[#allocation2 + $0x58] sm:$0xff]   ;;  %p1033_p6 = scmp.lt.s32.totalorder %s771_s22, %s771_s22 }
  0x13   :  { %863 = vmatprep.subr.bf16.mxu1 %v955_v6  ;;  %v962_v13 = vld [vmem:[#allocation2 + $0x20] sm:$0xff]   ;;  %v966_v17 = vld [vmem:[#allocation2 + $0x18] sm:$0xff]   ;;  %v969_v20 = vld [vmem:[#allocation2 + $0x50] sm:$0xff]   ;;  %v46_v34 = vsub.s32 %v43_v28, %v45_v29 }
  0x14   :  { %842 = vmatpush3.bf16.msra.mxu0 %v954_v5  ;;  %v963_v14 = vld [vmem:[#allocation2 + $0xe0] sm:$0xff]   ;;  %v967_v18 = vld [vmem:[#allocation2 + $0xd8] sm:$0xff]   ;;  %v970_v24 = vld [vmem:[#allocation2 + $0x10] sm:$0xff]  }
  0x15   :  { %843 = vmatprep.subr.bf16.mxu0 %v957_v8  ;;  %v964_v15 = vld [vmem:[#allocation2 + $0xa0] sm:$0xff]   ;;  %v968_v19 = vld [vmem:[#allocation2 + $0x98] sm:$0xff]   ;;  %v971_v25 = vld [vmem:[#allocation2 + $0xd0] sm:$0xff]  }
  0x16   :  { %864 = vmatpush3.bf16.msra.mxu1 %v956_v7  ;;  %v972_v26 = vld [vmem:[#allocation2 + $0x90] sm:$0xff]   ;;  %v973_v27 = vld [vmem:[#allocation2 + $0x48] sm:$0xff]   ;;  %v977_v33 = vld [vmem:[#allocation2 + $0x40] sm:$0xff]  }
  0x17   :  { %865 = vmatprep.subr.bf16.mxu1 %v959_v10  ;;  %v974_v30 = vld [vmem:[#allocation2 + $0x8] sm:$0xff]   ;;  %v978_v35 = vld [vmem:[#allocation2] sm:$0xff]   ;;  %v981_v41 = vld [vmem:[#allocation2 + $0x178] sm:$0xff]  }
  0x18   :  { %844 = vmatpush3.bf16.msra.mxu0 %v958_v9  ;;  %v975_v31 = vld [vmem:[#allocation2 + $0xc8] sm:$0xff]   ;;  %v979_v36 = vld [vmem:[#allocation2 + $0xc0] sm:$0xff]   ;;  %v983_v48 = vld [vmem:[#allocation2 + $0x138] sm:$0xff]  }
  0x19   :  { %845 = vmatprep.subr.bf16.mxu0 %v961_v12  ;;  %v976_v32 = vld [vmem:[#allocation2 + $0x88] sm:$0xff]   ;;  %v36_v37 = vld [vmem:[%s1145_s0] sm:$0xff]  ;;  %v984_v50 = vld [vmem:[#allocation2 + $0x170] sm:$0xff]  }
  0x1a   :  { %866 = vmatpush3.bf16.msra.mxu1 %v960_v11  ;;  %v47_v38 = vrot.slane %v36_v37, %v46_v34  ;;  %v980_v39 = vld [vmem:[#allocation2 + $0x80] sm:$0xff]   ;;  %v40_v40 = vcombine.high %v36_v37, %v36_v37  ;;  %v985_v52 = vld [vmem:[#allocation2 + $0x130] sm:$0xff]   ;;  %v986_v53 = vld [vmem:[#allocation2 + $0x168] sm:$0xff]  }
  0x1b   :  { %867 = vmatprep.subr.bf16.mxu1 %v963_v14  ;;  %v987_v54 = vld [vmem:[#allocation2 + $0x128] sm:$0xff]   ;;  %v988_v55 = vld [vmem:[#allocation2 + $0x160] sm:$0xff]   ;;  %v990_v57 = vld [vmem:[#allocation2 + $0x158] sm:$0xff]  }
  0x1c   :  { %846 = vmatpush3.bf16.msra.mxu0 %v962_v13  ;;  %v55_v42 = vcombine.high %v47_v38, %v47_v38  ;;  %v54_v43 = vrot.slane %v40_v40, %v46_v34  ;;  %v80_v44 = vpack.c.bf16 %v47_v38, %v47_v38  ;;  %v989_v56 = vld [vmem:[#allocation2 + $0x120] sm:$0xff]   ;;  %v37_v59 = vld [vmem:[%s1145_s0 + $0x8] sm:$0x3f]  ;;  %v991_v60 = vld [vmem:[#allocation2 + $0x118] sm:$0xff]  }
  0x1d   :  { %847 = vmatprep.subr.bf16.mxu0 %v965_v16  ;;  %v998_v58 = vld [vmem:[#allocation2 + $0x180] sm:$0xff]   ;;  %v57_v61 = vcombine.high %v37_v59, %v37_v59  ;;  %v64_v62 = vrot.slane %v37_v59, %v46_v34  ;;  %v992_v63 = vld [vmem:[#allocation2 + $0x150] sm:$0xff]   ;;  %v994_v5 = vld [vmem:[#allocation2 + $0x148] sm:$0xff]  }
  0x1e   :  { %868 = vmatpush3.bf16.msra.mxu1 %v964_v15  ;;  %v81_v46 = vpack.c.bf16 %v55_v42, %v55_v42  ;;  %v56_v47 = vcombine.high %v54_v43, %v54_v43  ;;  %v82_v49 = vpack.c.bf16 %v54_v43, %v54_v43  ;;  %v993_v4 = vld [vmem:[#allocation2 + $0x110] sm:$0xff]   ;;  %v995_v6 = vld [vmem:[#allocation2 + $0x108] sm:$0xff]   ;;  %v996_v7 = vld [vmem:[#allocation2 + $0x140] sm:$0xff]  }
  0x1f   :  { %869 = vmatprep.subr.bf16.mxu1 %v967_v18  ;;  %v71_v0 = vrot.slane %v57_v61, %v46_v34  ;;  %v72_v1 = vcombine.high %v64_v62, %v64_v62  ;;  %v997_v8 = vld [vmem:[#allocation2 + $0x100] sm:$0xff]   ;;  %v84_v9 = vpack.c.bf16 %v64_v62, %v64_v62  ;;  %v1000_v10 = vld [vmem:[%s1148_s3 + $0x38] sm:$0xff]   ;;  %v1001_v11 = vld [vmem:[%s1148_s3 + $0x30] sm:$0xff]  }
  0x20   :  { %848 = vmatpush3.bf16.msra.mxu0 %v966_v17  ;;  %522 = vmatprep.mubr.bf16.mxu0 %v81_v46  ;;  %v83_v51 = vpack.c.bf16 %v56_v47, %v56_v47  ;;  %v1002_v12 = vld [vmem:[%s1148_s3 + $0x28] sm:$0xff]   ;;  %v1003_v13 = vld [vmem:[%s1148_s3 + $0x20] sm:$0xff]   ;;  %v1004_v14 = vld [vmem:[%s1148_s3 + $0x18] sm:$0xff]  }
  0x21   :  { %849 = vmatprep.subr.bf16.mxu0 %v969_v20  ;;  %v85_v2 = vpack.c.bf16 %v72_v1, %v72_v1  ;;  %v86_v3 = vpack.c.bf16 %v71_v0, %v71_v0  ;;  %v1005_v15 = vld [vmem:[%s1148_s3 + $0x10] sm:$0xff]   ;;  %v1006_v16 = vld [vmem:[%s1148_s3 + $0x8] sm:$0xff]   ;;  %v1007_v17 = vld [vmem:[%s1148_s3] sm:$0xff]  }
  0x22   :  { %870 = vmatpush3.bf16.msra.mxu1 %v968_v19  ;;  %562 = vmatprep.mubr.bf16.mxu1 %v83_v51 }
  0x23   :  { %871 = vmatprep.subr.bf16.mxu1 %v971_v25 }
  0x24   :  { %850 = vmatpush3.bf16.msra.mxu0 %v970_v24 }
  0x25   :  { %851 = vmatprep.subr.bf16.mxu0 %v973_v27 }
  0x26   :  { %872 = vmatpush3.bf16.msra.mxu1 %v972_v26 }
  0x27   :  { %873 = vmatprep.subr.bf16.mxu1 %v975_v31  ;;  %v779_v31 = vld [vmem:[%s1147_s2] ss:$0 sm:$0xff]  ;;  %s1028_s2 = scalar_lea.vmem %s771_s22, 32 }
  0x28   :  { %852 = vmatpush3.bf16.msra.mxu0 %v974_v30  ;;  %p1029_p5 = scmp.ne.s32.totalorder %s771_s22, %s1028_s2  ;;  %p1034_p7 = scmp.lt.s32.totalorder %s1028_s2, %s1028_s2 }
  0x29   :  { %853 = vmatprep.subr.bf16.mxu0 %v977_v33 }
  0x2a   :  { %874 = vmatpush3.bf16.msra.mxu1 %v976_v32  ;;  %p1035_p8 = por %p1034_p7, %p1033_p6 }
  0x2b   :  { %875 = vmatprep.subr.bf16.mxu1 %v979_v36 }
  0x2c   :  { %854 = vmatpush3.bf16.msra.mxu0 %v978_v35  ;;  %p1036_p9 = pnand %p1035_p8, %p1029_p5 }
  0x2d   :  { %883 = vmatprep.subr.bf16.mxu0 %v981_v41 }
  0x2e   :  { %876 = vmatpush3.bf16.msra.mxu1 %v980_v39 }
  0x2f   :  { %916 = vmatprep.subr.bf16.mxu1 %v1056_v45  ;;  %523 = vmatmul.mubr.bf16.vlgmr.msra.gmra.mxu0 %v80_v44  ;;  %v830_v44 = vld [vmem:[%s1149_s4] ss:$0 sm:$0xff] }
  0x30   :  { %884 = vmatpush3.bf16.msra.mxu0 %v983_v48  ;;  %602 = vmatprep.mubr.bf16.mxu0 %v85_v2 }
  0x31   :  { %563 = vmatmul.mubr.bf16.vlgmr.msra.gmra.mxu1 %v82_v49  ;;  %885 = vmatprep.subr.bf16.mxu0 %v984_v50 }
  0x32   :  { %918 = vmatprep.mubr.msk.bf16.mxu1 %vm1057_vm0, %v1056_v45  ;;  %917 = vmatpush3.bf16.msra.mxu1 %v998_v58 }
  0x33   :  { %922 = vmatprep.subr.bf16.mxu1 %v1056_v45 }
  0x34   :  { %886 = vmatpush3.bf16.msra.mxu0 %v985_v52 }
  0x35   :  { %887 = vmatprep.subr.bf16.mxu0 %v986_v53 }
  0x38   :  { %888 = vmatpush3.bf16.msra.mxu0 %v987_v54 }
  0x39   :  { %889 = vmatprep.subr.bf16.mxu0 %v988_v55  ;;  %919 = vmatmul.mubr.msk.bf16.vlgmr.msra.gmra.mxu1 %vm486_vm1, %v86_v3 }
  0x3a   :  { %938 = vmatprep.mubr.msk.bf16.mxu1 %vm1057_vm0, %v1056_v45  ;;  %923 = vmatpush3.bf16.msra.mxu1 %v1000_v10 }
  0x3b   :  { %924 = vmatprep.subr.bf16.mxu1 %v1056_v45 }
  0x3c   :  { %890 = vmatpush3.bf16.msra.mxu0 %v989_v56 }
  0x3d   :  { %891 = vmatprep.subr.bf16.mxu0 %v990_v57 }
  0x3e   :  { %925 = vmatpush3.bf16.msra.mxu1 %v1001_v11 }
  0x3f   :  { %926 = vmatprep.subr.bf16.mxu1 %v1056_v45 }
  0x40   :  { %892 = vmatpush3.bf16.msra.mxu0 %v991_v60 }
  0x41   :  { %893 = vmatprep.subr.bf16.mxu0 %v992_v63 }
  0x42   :  { %927 = vmatpush3.bf16.msra.mxu1 %v1002_v12 }
  0x43   :  { %928 = vmatprep.subr.bf16.mxu1 %v1056_v45 }
  0x44   :  { %894 = vmatpush3.bf16.msra.mxu0 %v993_v4 }
  0x45   :  { %895 = vmatprep.subr.bf16.mxu0 %v994_v5 }
  0x46   :  { %929 = vmatpush3.bf16.msra.mxu1 %v1003_v13 }
  0x47   :  { %930 = vmatprep.subr.bf16.mxu1 %v1056_v45 }
  0x48   :  { %896 = vmatpush3.bf16.msra.mxu0 %v995_v6 }
  0x49   :  { %897 = vmatprep.subr.bf16.mxu0 %v996_v7 }
  0x4a   :  { %931 = vmatpush3.bf16.msra.mxu1 %v1004_v14 }
  0x4b   :  { %932 = vmatprep.subr.bf16.mxu1 %v1056_v45 }
  0x4c   :  { %898 = vmatpush3.bf16.msra.mxu0 %v997_v8 }
  0x4e   :  { %933 = vmatpush3.bf16.msra.mxu1 %v1005_v15 }
  0x4f   :  { %603 = vmatmul.mubr.bf16.vlgmr.msra.gmra.mxu0 %v84_v9  ;;  %934 = vmatprep.subr.bf16.mxu1 %v1056_v45 }
  0x52   :  { %935 = vmatpush3.bf16.msra.mxu1 %v1006_v16 }
  0x53   :  { %936 = vmatprep.subr.bf16.mxu1 %v1056_v45 }
  0x56   :  { %937 = vmatpush3.bf16.msra.mxu1 %v1007_v17 }
  0xef   :  { %v855_v18 = vpop.f32.mrf.mxu0 }
  0xf1   :  { %v856_v19 = vpop.f32.mrf.mxu0  ;;  %v877_v20 = vpop.f32.mrf.mxu1 }
  0xf2   :  { %v857_v30 = vadd.f32 %v856_v19, %v855_v18 }
  0xf3   :  { %v858_v21 = vpop.f32.mrf.mxu0  ;;  %v878_v22 = vpop.f32.mrf.mxu1 }
  0xf4   :  { %v525_v32 = vadd.f32 %v857_v30, %v779_v31  ;;  %v879_v33 = vadd.f32 %v878_v22, %v877_v20 }
  0xf5   :  { %v859_v23 = vpop.f32.mrf.mxu0  ;;  %v880_v24 = vpop.f32.mrf.mxu1 }
  0xf6   :  { %v565_v36 = vadd.f32 %v879_v33, %v525_v32 }
  0xf7   :  { %v881_v25 = vpop.f32.mrf.mxu1 }
  0xf9   :  { %v644_v26 = vpop.f32.mrf.mxu1 }
  0xfb   :  { %v920_v27 = vpop.f32.mrf.mxu1 }
  0xfd   :  { %v647_v28 = vpop.f32.mrf.mxu1 }
  0xff   :  { %v921_v29 = vpop.f32.mrf.mxu1 }
 0x10f   :  { %v899_v34 = vpop.f32.mrf.mxu0 }
 0x111   :  { %v900_v35 = vpop.f32.mrf.mxu0 }
 0x112   :  { %v901_v37 = vadd.f32 %v900_v35, %v899_v34 }
 0x113   :  { %v902_v38 = vpop.f32.mrf.mxu0 }
 0x114   :  { %v605_v39 = vadd.f32 %v901_v37, %v565_v36 }
 0x115   :  { %v903_v40 = vpop.f32.mrf.mxu0 }
 0x116   :  { %v645_v41 = vadd.f32 %v644_v26, %v605_v39 }
 0x118   :  { %v650_v42 = vmax.f32 %v645_v41, 0.0 }
 0x11a   :  { %v651_v43 = vpack.c.bf16 %v650_v42, %v650_v42 }
 0x11c   :  { %939 = vmatmul.mubr.bf16.vlgmr.msra.gmra.mxu1 %v651_v43 }
 0x1dc   :  { %v757_v45 = vpop.f32.mrf.mxu1 }
 0x1dd   :  { %v758_v46 = vadd.f32 %v830_v44, %v757_v45 }
 0x1de   :  { %v940_v47 = vpop.f32.mrf.mxu1 }
 0x1df   :  { %763 = vst [vmem:[#allocation5] sm:$0x3] %v758_v46 }
 0x1e0   :  { %v760_v48 = vpop.f32.mrf.mxu1 }
 0x1e1   :  { %1039 = shalt.err (!%p1036_p9)
}
 0x1e2   :  { %773 = dma.vmem_to_hbm [thread:$0]  %s771_s22, 32, %s1150_s5, [#allocation4]   ;;  %v941_v49 = vpop.f32.mrf.mxu1 }
 0x1e3   :  { %1050 = dma.done.wait [#allocation4], 32  }
 0x1e4   :  { %1051 = vsyncadd [#allocation4], 4294967264 }
 0x1e5   :  { %777 = vsyncpa [#allocation3], 1 }
 0x1e6   :  { %778 = vsyncpa [#allocation4], 1 }

</bundles_post_ra>
